<compile_context>
chip_gen: v5e
topology: v5e:2x2
jax: 0.10.0
libtpu: 0.0.40
codegen_flags: <defaults>
</compile_context>

<pallas_src>
import functools

import jax
import jax.numpy as jnp
from jax import lax
from jax.experimental import pallas as pl
from jax.experimental.pallas import tpu as pltpu

_MIB = 1024 * 1024


def _round_up(n, m):
    return ((n + m - 1) // m) * m


def _vmem_capacity_bytes():
    try:
        info = pltpu.get_tpu_info()
        cap = getattr(info, "vmem_capacity_bytes", None)
        if cap:
            return int(cap)
    except Exception:
        pass
    return 64 * _MIB  # conservative default: v7x per-TensorCore VMEM


# --------------- single-pass kernel: whole row (HW) in one block ---------------

def _adain_rows_kernel(x_ref, w_ref, b_ref, o_ref, *, eps, hw, masked):
    """x_ref: (TBC, HW) tile; w_ref/b_ref: (TBC, 1); o_ref: (TBC, HW)."""
    x = x_ref[...].astype(jnp.float32)
    if masked:
        # HW not lane-aligned and no HBM padding anymore -> keep physical pad
        # lanes out of the statistics (belt-and-braces, one cheap select).
        lane = lax.broadcasted_iota(jnp.int32, x.shape, 1)
        xs = jnp.where(lane < hw, x, 0.0)
    else:
        xs = x
    inv_n = jnp.float32(1.0 / hw)
    s1 = jnp.sum(xs, axis=-1, keepdims=True)
    s2 = jnp.sum(xs * xs, axis=-1, keepdims=True)
    mean = s1 * inv_n
    var = jnp.maximum(s2 * inv_n - mean * mean, 0.0)      # clamp: cancellation safety
    scale = lax.rsqrt(var + eps) * w_ref[...]             # fold affine scale
    o_ref[...] = ((x - mean) * scale + b_ref[...]).astype(o_ref.dtype)


# --------------- two-pass fallback for very large H*W ---------------

def _adain_stats_kernel(x_ref, mean_ref, inv_ref, s1_ref, s2_ref, *, eps, hw, thw):
    """Grid (bc_tile, hw_chunk); accumulate sum/sumsq across the HW chunks."""
    j = pl.program_id(1)

    @pl.when(j == 0)
    def _():
        s1_ref[...] = jnp.zeros_like(s1_ref)
        s2_ref[...] = jnp.zeros_like(s2_ref)

    x = x_ref[...].astype(jnp.float32)
    # Last HW chunk may reach past the true row length; mask those lanes.
    lane = lax.broadcasted_iota(jnp.int32, x.shape, 1) + j * thw
    x = jnp.where(lane < hw, x, 0.0)
    s1_ref[...] += jnp.sum(x, axis=-1, keepdims=True)
    s2_ref[...] += jnp.sum(x * x, axis=-1, keepdims=True)

    @pl.when(j == pl.num_programs(1) - 1)
    def _():
        inv_n = jnp.float32(1.0 / hw)
        mean = s1_ref[...] * inv_n
        var = jnp.maximum(s2_ref[...] * inv_n - mean * mean, 0.0)
        mean_ref[...] = mean
        inv_ref[...] = lax.rsqrt(var + eps)


def _adain_apply_kernel(x_ref, mean_ref, inv_ref, w_ref, b_ref, o_ref):
    x = x_ref[...].astype(jnp.float32)
    scale = inv_ref[...] * w_ref[...]
    o_ref[...] = ((x - mean_ref[...]) * scale + b_ref[...]).astype(o_ref.dtype)


# --------------- wrapper ---------------

def adaptive_instance_norm_2d(x, weight, bias, eps=1e-5, *,
                              two_pass=None, hw_chunk=None):
    """AdaIN forward. x: (B, C, H, W) NCHW; weight, bias: (B*C,). Returns NCHW."""
    B, C, H, W = x.shape
    BC = B * C
    HW = H * W
    itemsize = jnp.dtype(x.dtype).itemsize
    row_align = max(8, 32 // itemsize)        # 8 rows f32, 16 rows bf16

    vmem_cap = _vmem_capacity_bytes()
    tile_budget = (vmem_cap * 3) // 8         # ~24 MiB on 64 MiB parts, ~48 MiB on 128 MiB

    # single-pass per-row working set: 2x in + 2x out (double-buffered) plus
    # ~2 f32 tiles of elementwise intermediates
    per_row = 4 * HW * itemsize + 8 * HW

    if two_pass is None:
        two_pass = row_align * per_row > tile_budget

    x2d = x.reshape(BC, HW)
    w2d = weight.reshape(BC, 1).astype(jnp.float32)
    b2d = bias.reshape(BC, 1).astype(jnp.float32)

    if not two_pass:
        # ---- single pass: one (tbc, HW) block per grid step ----
        tbc = max(row_align, tile_budget // per_row)
        tbc = min(tbc, _round_up(BC, row_align))
        # keep the parallel axis >= 2 steps (v7x megacore) and some pipeline depth
        min_steps = min(8, pl.cdiv(BC, row_align))
        if min_steps > 1:
            tbc = min(tbc, _round_up(pl.cdiv(BC, min_steps), row_align))
        tbc = max(row_align, (tbc // row_align) * row_align)
        grid_bc = pl.cdiv(BC, tbc)

        vmem_limit = int(min(max(tbc * per_row + 2 * _MIB, 32 * _MIB),
                             (vmem_cap * 7) // 8))

        kernel = functools.partial(_adain_rows_kernel, eps=float(eps), hw=HW,
                                   masked=(HW % 128 != 0))
        cost = pl.CostEstimate(
            flops=int(7 * BC * HW),
            transcendentals=int(BC),
            bytes_accessed=int(2 * BC * HW * itemsize + 2 * BC * 4),
        )
        out2d = pl.pallas_call(
            kernel,
            out_shape=jax.ShapeDtypeStruct((BC, HW), x.dtype),
            grid_spec=pltpu.PrefetchScalarGridSpec(
                num_scalar_prefetch=0,
                grid=(grid_bc,),
                in_specs=[
                    pl.BlockSpec((tbc, HW), lambda i: (i, 0)),   # x tile (full HW)
                    pl.BlockSpec((tbc, 1), lambda i: (i, 0)),    # weight per-tile
                    pl.BlockSpec((tbc, 1), lambda i: (i, 0)),    # bias per-tile
                ],
                out_specs=pl.BlockSpec((tbc, HW), lambda i: (i, 0)),
            ),
            compiler_params=pltpu.CompilerParams(
                dimension_semantics=("parallel",),
                vmem_limit_bytes=vmem_limit,
            ),
            cost_estimate=cost,
        )(x2d, w2d, b2d)
        return out2d.reshape(B, C, H, W)

    # ---- two-pass fallback: grid (BC-tile, HW-chunk), ~1.5x HBM traffic ----
    tbc = max(row_align, min(row_align, _round_up(BC, row_align)))
    per_elem = 4 * itemsize + 8               # 2x in + 2x out DB + ~2 f32 intermediates
    if hw_chunk is None:
        thw = max(512, (tile_budget // (tbc * per_elem)) // 128 * 128)
    else:
        thw = max(128, (int(hw_chunk) // 128) * 128)
    thw = min(thw, _round_up(HW, 128))
    grid_bc = pl.cdiv(BC, tbc)
    grid_hw = pl.cdiv(HW, thw)

    vmem_limit = int(min(max(tbc * thw * per_elem + 2 * _MIB, 32 * _MIB),
                         (vmem_cap * 7) // 8))

    mean2d, inv2d = pl.pallas_call(
        functools.partial(_adain_stats_kernel, eps=float(eps), hw=HW, thw=thw),
        out_shape=(jax.ShapeDtypeStruct((BC, 1), jnp.float32),
                   jax.ShapeDtypeStruct((BC, 1), jnp.float32)),
        grid_spec=pltpu.PrefetchScalarGridSpec(
            num_scalar_prefetch=0,
            grid=(grid_bc, grid_hw),
            in_specs=[pl.BlockSpec((tbc, thw), lambda i, j: (i, j))],
            out_specs=[pl.BlockSpec((tbc, 1), lambda i, j: (i, 0)),
                       pl.BlockSpec((tbc, 1), lambda i, j: (i, 0))],
            scratch_shapes=[pltpu.VMEM((tbc, 1), jnp.float32),
                            pltpu.VMEM((tbc, 1), jnp.float32)],
        ),
        compiler_params=pltpu.CompilerParams(
            dimension_semantics=("parallel", "arbitrary"),
            vmem_limit_bytes=vmem_limit,
        ),
        cost_estimate=pl.CostEstimate(
            flops=int(4 * BC * HW), transcendentals=int(BC),
            bytes_accessed=int(BC * HW * itemsize + 2 * BC * 4)),
    )(x2d)

    out2d = pl.pallas_call(
        _adain_apply_kernel,
        out_shape=jax.ShapeDtypeStruct((BC, HW), x.dtype),
        grid_spec=pltpu.PrefetchScalarGridSpec(
            num_scalar_prefetch=0,
            grid=(grid_bc, grid_hw),
            in_specs=[
                pl.BlockSpec((tbc, thw), lambda i, j: (i, j)),   # x chunk
                pl.BlockSpec((tbc, 1), lambda i, j: (i, 0)),     # mean
                pl.BlockSpec((tbc, 1), lambda i, j: (i, 0)),     # 1/sqrt(var+eps)
                pl.BlockSpec((tbc, 1), lambda i, j: (i, 0)),     # weight
                pl.BlockSpec((tbc, 1), lambda i, j: (i, 0)),     # bias
            ],
            out_specs=pl.BlockSpec((tbc, thw), lambda i, j: (i, j)),
        ),
        compiler_params=pltpu.CompilerParams(
            dimension_semantics=("parallel", "parallel"),
            vmem_limit_bytes=vmem_limit,
        ),
        cost_estimate=pl.CostEstimate(
            flops=int(4 * BC * HW), transcendentals=0,
            bytes_accessed=int(2 * BC * HW * itemsize + 4 * BC * 4)),
    )(x2d, mean2d, inv2d, w2d, b2d)
    return out2d.reshape(B, C, H, W)


def _adain_ref(x, weight, bias, eps):
    """Pure-JAX reference: instance norm with biased variance + affine."""
    B, C, H, W = x.shape
    xr = x.reshape(B * C, H * W).astype(jnp.float32)
    mean = xr.mean(axis=-1, keepdims=True)
    var = ((xr - mean) ** 2).mean(axis=-1, keepdims=True)
    y = ((xr - mean) * lax.rsqrt(var + eps)
         * weight[:, None].astype(jnp.float32) + bias[:, None].astype(jnp.float32))
    return y.reshape(B, C, H, W)


if __name__ == "__main__":
    key = jax.random.PRNGKey(0)
    eps = 1e-5

    cases = [
        ((2, 4, 16, 16), jnp.float32, {}),                      # aligned: HW=256, BC=8
        ((3, 5, 10, 10), jnp.float32, {}),                      # ragged: HW=100, BC=15
        ((2, 16, 16, 16), jnp.bfloat16, {}),                    # bf16 I/O
        ((2, 4, 12, 12), jnp.float32,
         dict(two_pass=True, hw_chunk=128)),                    # exercise large-HW fallback
    ]

    for (B, C, H, W), dtype, kwargs in cases:
        k_x, k_w, k_b, key = jax.random.split(key, 4)
        x = jax.random.normal(k_x, (B, C, H, W), dtype=jnp.float32).astype(dtype)
        # In MUNIT/GANILLA these are assigned from the style MLP before calling
        # AdaIN; here we just build deterministic params of the right shape (B*C,).
        weight = jax.random.normal(k_w, (B * C,), dtype=jnp.float32) * 0.5 + 1.0
        bias = jax.random.normal(k_b, (B * C,), dtype=jnp.float32) * 0.1

        out = adaptive_instance_norm_2d(x, weight, bias, eps=eps, **kwargs)
        out = jax.block_until_ready(out)

        ref = _adain_ref(x.astype(jnp.float32), weight, bias, eps).astype(dtype)
        tol = 1e-4 if dtype == jnp.float32 else 5e-2
        assert jnp.allclose(out.astype(jnp.float32), ref.astype(jnp.float32),
                            atol=tol, rtol=tol), \
            f"mismatch for {(B, C, H, W)} {dtype} {kwargs}"

    print("KERNEL_OK")
</pallas_src>

<mosaic_0001>
module attributes {stable_mosaic.version = 11 : i64} {
  func.func @_adain_rows_kernel(%arg0: i32, %arg1: memref<8x256xf32, #tpu.memory_space<vmem>>, %arg2: memref<8x1xf32, #tpu.memory_space<vmem>>, %arg3: memref<8x1xf32, #tpu.memory_space<vmem>>, %arg4: memref<8x256xf32, #tpu.memory_space<vmem>>) attributes {dimension_semantics = [#tpu.dimension_semantics<parallel>], iteration_bounds = array<i64: 1>, scalar_prefetch = 0 : i64, scratch_operands = 0 : i64, tpu.core_type = #tpu.core_type<tc>, window_params = [{transform_indices = @transform_0, window_bounds = array<i64: 8, 256>}, {transform_indices = @transform_1, window_bounds = array<i64: 8, 1>}, {transform_indices = @transform_2, window_bounds = array<i64: 8, 1>}, {transform_indices = @transform_3, window_bounds = array<i64: 8, 256>}]} {
    %c0 = arith.constant 0 : index
    %c0_0 = arith.constant 0 : index
    %0 = vector.load %arg1[%c0, %c0_0] : memref<8x256xf32, #tpu.memory_space<vmem>>, vector<8x256xf32>
    %cst = arith.constant dense<0.000000e+00> : vector<8xf32>
    %1 = vector.multi_reduction <add>, %0, %cst [1] : vector<8x256xf32> to vector<8xf32>
    %2 = vector.shape_cast %1 : vector<8xf32> to vector<8x1xf32>
    %3 = arith.mulf %0, %0 : vector<8x256xf32>
    %cst_1 = arith.constant dense<0.000000e+00> : vector<8xf32>
    %4 = vector.multi_reduction <add>, %3, %cst_1 [1] : vector<8x256xf32> to vector<8xf32>
    %5 = vector.shape_cast %4 : vector<8xf32> to vector<8x1xf32>
    %cst_2 = arith.constant 3.906250e-03 : f32
    %6 = vector.broadcast %cst_2 : f32 to vector<8x1xf32>
    %7 = arith.mulf %2, %6 : vector<8x1xf32>
    %cst_3 = arith.constant 3.906250e-03 : f32
    %8 = vector.broadcast %cst_3 : f32 to vector<8x1xf32>
    %9 = arith.mulf %5, %8 : vector<8x1xf32>
    %10 = arith.mulf %7, %7 : vector<8x1xf32>
    %11 = arith.subf %9, %10 : vector<8x1xf32>
    %cst_4 = arith.constant 0.000000e+00 : f32
    %12 = vector.broadcast %cst_4 : f32 to vector<8x1xf32>
    %13 = arith.maximumf %11, %12 : vector<8x1xf32>
    %cst_5 = arith.constant 9.99999974E-6 : f32
    %14 = vector.broadcast %cst_5 : f32 to vector<8x1xf32>
    %15 = arith.addf %13, %14 : vector<8x1xf32>
    %16 = math.rsqrt %15 : vector<8x1xf32>
    %c0_6 = arith.constant 0 : index
    %c0_7 = arith.constant 0 : index
    %17 = vector.load %arg2[%c0_6, %c0_7] : memref<8x1xf32, #tpu.memory_space<vmem>>, vector<8x1xf32>
    %18 = arith.mulf %16, %17 : vector<8x1xf32>
    %19 = vector.broadcast %7 : vector<8x1xf32> to vector<8x256xf32>
    %20 = arith.subf %0, %19 : vector<8x256xf32>
    %21 = vector.broadcast %18 : vector<8x1xf32> to vector<8x256xf32>
    %22 = arith.mulf %20, %21 : vector<8x256xf32>
    %c0_8 = arith.constant 0 : index
    %c0_9 = arith.constant 0 : index
    %23 = vector.load %arg3[%c0_8, %c0_9] : memref<8x1xf32, #tpu.memory_space<vmem>>, vector<8x1xf32>
    %24 = vector.broadcast %23 : vector<8x1xf32> to vector<8x256xf32>
    %25 = arith.addf %22, %24 : vector<8x256xf32>
    %c0_10 = arith.constant 0 : index
    %c0_11 = arith.constant 0 : index
    %26 = vector.load %arg4[%c0_10, %c0_11] : memref<8x256xf32, #tpu.memory_space<vmem>>, vector<8x256xf32>
    tpu.vector_store %arg4[%c0_10, %c0_11], %25 {strides = array<i32>} : memref<8x256xf32, #tpu.memory_space<vmem>>, vector<8x256xf32>,
    return
  }
  func.func @transform_0(%arg0: i32) -> (i32, i32) {
    %c0_i32 = arith.constant 0 : i32
    %c0_i32_0 = arith.constant 0 : i32
    return %arg0, %c0_i32 : i32, i32
  }
  func.func @transform_1(%arg0: i32) -> (i32, i32) {
    %c0_i32 = arith.constant 0 : i32
    %c0_i32_0 = arith.constant 0 : i32
    return %arg0, %c0_i32 : i32, i32
  }
  func.func @transform_2(%arg0: i32) -> (i32, i32) {
    %c0_i32 = arith.constant 0 : i32
    %c0_i32_0 = arith.constant 0 : i32
    return %arg0, %c0_i32 : i32, i32
  }
  func.func @transform_3(%arg0: i32) -> (i32, i32) {
    %c0_i32 = arith.constant 0 : i32
    %c0_i32_0 = arith.constant 0 : i32
    return %arg0, %c0_i32 : i32, i32
  }
}

</mosaic_0001>

<bundles_post_ra>
// kernel: tpu_custom_call.1
= control target key start
LH: loop header
LB: loop body
LE: loop exit
PB: predicated region body
PF: predicated region fallthrough
CT: control target
= control target key end

     0   :  { %s147_s0 = inlined_call_operand.vmem [shape: f32[8,256], index: 0, kind: input, shape index: {}]   ;;  %s148_s1 = inlined_call_operand.vmem [shape: f32[8,1], index: 1, kind: input, shape index: {}]   ;;  %s149_s2 = inlined_call_operand.vmem [shape: f32[8,1], index: 2, kind: input, shape index: {}]   ;;  %s150_s3 = inlined_call_operand.hbm [shape: f32[8,256], index: 3, kind: output, shape index: {}]  }
   0x1   :  { %v15_v0 = vld [vmem:[%s147_s0] sm:$0xff]  ;;  %v16_v1 = vld [vmem:[%s147_s0 + $0x8] sm:$0xff] }
   0x2   :  { %8 = vsyncpa [#allocation3], 0  ;;  %v17_v2 = vadd.f32 %v16_v1, %v15_v0  ;;  %v20_v3 = vmul.f32 %v15_v0, %v15_v0  ;;  %v21_v4 = vmul.f32 %v16_v1, %v16_v1  ;;  %v110_v6 = vmov 0   ;;  %v41_v21 = vld [vmem:[%s148_s1] sm:$0xff]  ;;  %s111_s19 = smov [#allocation2]   ;;  %s69_s1 = sshll.u32 %s150_s3, 4  ;;  %s70_s1 = int_to_ptr.hbm [resolvable:$true] %s69_s1 }
   0x3   :  { %80 = vset.pattern.permute.xlu1 %v110_v6  ;;  %81 = vset.pattern.permute.xlu0 %v110_v6  ;;  %v52_v24 = vld [vmem:[%s149_s2] sm:$0xff]  ;;  %s67_s20 = sshll.u32 %s111_s19, 4  ;;  %s68_s20 = int_to_ptr.vmem [resolvable:$true] %s67_s20 }
   0x4   :  { %18 = vadd.xlane.f32.xlu0 %v17_v2  ;;  %v22_v5 = vadd.f32 %v21_v4, %v20_v3 }
   0xc   :  { %23 = vadd.xlane.f32.xlu0 %v22_v5 }
  0x77   :  { %v19_v7 = vpop.xlane.xlu0 %18 }
  0x78   :  { %v25_v8 = vmul.f32 0.00390625, %v19_v7 }
  0x7a   :  { %v27_v10 = vmul.f32 %v25_v8, %v25_v8  ;;  %v43_v26 = vsub.f32 %v15_v0, %v25_v8  ;;  %v44_v27 = vsub.f32 %v16_v1, %v25_v8 }
  0x7f   :  { %v24_v9 = vpop.xlane.xlu0 %23 }
  0x80   :  { %v26_v11 = vmul.f32 0.00390625, %v24_v9 }
  0x82   :  { %v28_v12 = vsub.f32 %v26_v11, %v27_v10 }
  0x84   :  { %v29_v13 = vmax.f32 %v28_v12, 0.0 }
  0x86   :  { %v30_v14 = vadd.f32 1e-05, %v29_v13 }
  0x88   :  { %82 = vrsqrt.f32 %v30_v14  ;;  %vm37_vm1 = vweird.f32 %v30_v14 }
  0x8e   :  { %v83_v15 = vpop.eup %82 }
  0x8f   :  { %v32_v16 = vmul.f32 %v83_v15, %v30_v14  ;;  %vm38_vm0 = vweird.f32 %v83_v15 }
  0x90   :  { %vm39_vm2 = vmor %vm37_vm1, %vm38_vm0 }
  0x91   :  { %v33_v17 = vmul.f32 %v83_v15, %v32_v16 }
  0x93   :  { %v34_v18 = vmul.f32 0.5, %v33_v17 }
  0x95   :  { %v35_v19 = vsub.f32 1.5, %v34_v18 }
  0x97   :  { %v36_v20 = vmul.f32 %v83_v15, %v35_v19 }
  0x99   :  { %v40_v22 = vsel %vm39_vm2, %v83_v15, %v36_v20 }
  0x9a   :  { %v42_v23 = vmul.f32 %v41_v21, %v40_v22 }
  0x9c   :  { %47 = vperm.xlu1 %80, %v42_v23  }
  0xa4   :  { %55 = vperm.xlu1 %80, %v52_v24  }
 0x10e   :  { %v48_v25 = vpop.permute.xlu1 %47 }
 0x10f   :  { %v50_v28 = vmul.f32 %v48_v25, %v43_v26  ;;  %v51_v29 = vmul.f32 %v48_v25, %v44_v27 }
 0x116   :  { %v56_v30 = vpop.permute.xlu1 %55 }
 0x117   :  { %v58_v31 = vadd.f32 %v56_v30, %v50_v28  ;;  %v59_v32 = vadd.f32 %v56_v30, %v51_v29 }
 0x119   :  { %60 = vst [vmem:[#allocation2] sm:$0xff] %v58_v31 }
 0x11a   :  { %61 = vst [vmem:[#allocation2 + $0x8] sm:$0xff] %v59_v32 }
 0x11b   :  { %72 = dma.vmem_to_hbm [thread:$0]  %s68_s20, 256, %s70_s1, [#allocation3]  }
 0x11c   :  { %108 = dma.done.wait [#allocation3], 256  }
 0x11d   :  { %109 = vsyncadd [#allocation3], 4294967040 }
 0x11e   :  { %77 = vsyncpa [#allocation3], 1 }

</bundles_post_ra>
